<compile_context>
chip_gen: v6e
topology: v6e:2x2x1
jax: 0.10.0
libtpu: 0.0.40
codegen_flags: <defaults>
</compile_context>

<pallas_src>
import functools

import jax
import jax.numpy as jnp
from jax.experimental import pallas as pl
from jax.experimental.pallas import tpu as pltpu

INPUT_SIZE = 4
HIDDEN_SIZE = 16
NUM_CLASSES = 3

K_PAD = 8   # input features padded 4 -> 8 sublanes (alignment; zero cols in W1)
C_PAD = 8   # class rows padded 3 -> 8 in W2/b2 so matmul shapes are 8-aligned


def _round_up(x, m):
    return (x + m - 1) // m * m


def _feedforward_kernel(xt_ref, w1_ref, b1_ref, w2_ref, b2_ref, ot_ref):
    # Feature-major: batch is the lane axis.
    xt = xt_ref[...]                                                   # (K_PAD, tb)
    # fc1 + ReLU:  h[j, n] = relu(sum_k W1[j, k] * x[n, k] + b1[j])
    h = jnp.dot(w1_ref[...], xt, preferred_element_type=jnp.float32)   # (16, tb)
    h = jnp.maximum(h + b1_ref[...], 0.0)
    # fc2 + ReLU:  o[c, n] = relu(sum_j W2[c, j] * h[j, n] + b2[c])
    o = jnp.dot(w2_ref[...], h, preferred_element_type=jnp.float32)    # (C_PAD, tb)
    o = jnp.maximum(o + b2_ref[...], 0.0)
    # Store only the real class rows -> 12 B/sample of HBM writeback.
    ot_ref[...] = o[:NUM_CLASSES, :].astype(ot_ref.dtype)


def prepare_params(w1, b1, w2, b2):
    """One-time packing outside the hot path (PyTorch Linear layout in).

    w1: [hidden, input], b1: [hidden], w2: [classes, hidden], b2: [classes]
      -> W1p [hidden, K_PAD]   input features zero-padded 4 -> 8
         B1p [hidden, 1]       column bias (broadcast over batch lanes)
         W2p [C_PAD, hidden]   class rows zero-padded 3 -> 8
         B2p [C_PAD, 1]        column bias, padded rows are 0
    Zero padding keeps the math exact; padded rows/cols stay 0 through both
    matmul + bias + ReLU stages and are never stored.
    """
    w1p = jnp.zeros((HIDDEN_SIZE, K_PAD), jnp.float32)
    w1p = w1p.at[:, :INPUT_SIZE].set(w1.astype(jnp.float32))
    b1p = b1.astype(jnp.float32).reshape(HIDDEN_SIZE, 1)
    w2p = jnp.zeros((C_PAD, HIDDEN_SIZE), jnp.float32)
    w2p = w2p.at[:NUM_CLASSES, :].set(w2.astype(jnp.float32))
    b2p = jnp.zeros((C_PAD, 1), jnp.float32)
    b2p = b2p.at[:NUM_CLASSES, 0].set(b2.astype(jnp.float32))
    return w1p, b1p, w2p, b2p


def _pick_tile(batch, block_b):
    """Batch tile in samples (lane axis): multiple of 128, <= block_b,
    and >= 2 grid steps whenever the 128-padded batch allows it (v7x megacore /
    pipeline depth)."""
    b_min = _round_up(batch, 128)
    if b_min <= 128:
        return 128
    half = _round_up(-(-b_min // 2), 128)
    return max(128, min(block_b, half))


@functools.partial(jax.jit, static_argnames=("block_b",))
def feedforward(x, w1p, b1p, w2p, b2p, *, block_b=8192):
    """x: [B, INPUT_SIZE]; params from prepare_params(). Returns [B, NUM_CLASSES]."""
    B = x.shape[0]
    tb = _pick_tile(B, block_b)
    b_pad = _round_up(B, tb)

    # Feature-major input: batch along lanes (dense 128 samples / lane row),
    # features along sublanes (padded to 8).  One tiny wrapper-side relayout.
    xt = jnp.zeros((K_PAD, b_pad), jnp.float32).at[:INPUT_SIZE, :B].set(x.T)

    out_t = pl.pallas_call(
        _feedforward_kernel,
        out_shape=jax.ShapeDtypeStruct((NUM_CLASSES, b_pad), jnp.float32),
        grid=(b_pad // tb,),
        in_specs=[
            pl.BlockSpec((K_PAD, tb), lambda i: (0, i)),            # x: batch-tiled
            pl.BlockSpec((HIDDEN_SIZE, K_PAD), lambda i: (0, 0)),   # W1p: resident
            pl.BlockSpec((HIDDEN_SIZE, 1), lambda i: (0, 0)),       # b1:  resident
            pl.BlockSpec((C_PAD, HIDDEN_SIZE), lambda i: (0, 0)),   # W2p: resident
            pl.BlockSpec((C_PAD, 1), lambda i: (0, 0)),             # b2:  resident
        ],
        out_specs=pl.BlockSpec((NUM_CLASSES, tb), lambda i: (0, i)),  # 12 B/sample
        compiler_params=pltpu.CompilerParams(
            dimension_semantics=("parallel",)),
    )(xt, w1p, b1p, w2p, b2p)

    # Tiny (3, B) -> (B, 3) relayout; no full padded-slab re-read.
    return out_t[:, :B].T


def feedforward_ref(x, w1, b1, w2, b2):
    h = jnp.maximum(x @ w1.T + b1, 0.0)
    return jnp.maximum(h @ w2.T + b2, 0.0)


if __name__ == "__main__":
    key = jax.random.PRNGKey(0)
    kx, k1, k2, k3, k4 = jax.random.split(key, 5)

    # Deterministic param init (PyTorch-style uniform bounds, synthetic values).
    bound1 = 1.0 / (INPUT_SIZE ** 0.5)
    bound2 = 1.0 / (HIDDEN_SIZE ** 0.5)
    w1 = jax.random.uniform(k1, (HIDDEN_SIZE, INPUT_SIZE), jnp.float32,
                            -bound1, bound1)
    b1 = jax.random.uniform(k2, (HIDDEN_SIZE,), jnp.float32, -bound1, bound1)
    w2 = jax.random.uniform(k3, (NUM_CLASSES, HIDDEN_SIZE), jnp.float32,
                            -bound2, bound2)
    b2 = jax.random.uniform(k4, (NUM_CLASSES,), jnp.float32, -bound2, bound2)

    # Pack / pad parameters once (outside the per-call hot path).
    params = prepare_params(w1, b1, w2, b2)

    # batch=8: single-step grid; batch=300: multi-step (padded, 2-step) grid.
    for batch in (8, 300):
        x = jax.random.normal(kx, (batch, INPUT_SIZE), dtype=jnp.float32)
        out = jax.block_until_ready(feedforward(x, *params))
        ref = feedforward_ref(x, w1, b1, w2, b2)
        assert out.shape == (batch, NUM_CLASSES)
        assert jnp.allclose(out, ref, atol=1e-4, rtol=1e-4), f"mismatch @ B={batch}"

    print("KERNEL_OK")
</pallas_src>

<mosaic_0001>
module attributes {stable_mosaic.version = 11 : i64} {
  func.func @_feedforward_kernel(%arg0: i32, %arg1: memref<8x128xf32, #tpu.memory_space<vmem>>, %arg2: memref<16x8xf32, #tpu.memory_space<vmem>>, %arg3: memref<16x1xf32, #tpu.memory_space<vmem>>, %arg4: memref<8x16xf32, #tpu.memory_space<vmem>>, %arg5: memref<8x1xf32, #tpu.memory_space<vmem>>, %arg6: memref<3x128xf32, #tpu.memory_space<vmem>>) attributes {dimension_semantics = [#tpu.dimension_semantics<parallel>], iteration_bounds = array<i64: 1>, scalar_prefetch = 0 : i64, scratch_operands = 0 : i64, tpu.core_type = #tpu.core_type<tc>, window_params = [{transform_indices = @transform_0, window_bounds = array<i64: 8, 128>}, {pipeline_mode = #tpu.pipeline_mode<synchronous>, transform_indices = @transform_1, window_bounds = array<i64: 16, 8>}, {pipeline_mode = #tpu.pipeline_mode<synchronous>, transform_indices = @transform_2, window_bounds = array<i64: 16, 1>}, {pipeline_mode = #tpu.pipeline_mode<synchronous>, transform_indices = @transform_3, window_bounds = array<i64: 8, 16>}, {pipeline_mode = #tpu.pipeline_mode<synchronous>, transform_indices = @transform_4, window_bounds = array<i64: 8, 1>}, {transform_indices = @transform_5, window_bounds = array<i64: 3, 128>}]} {
    %c0 = arith.constant 0 : index
    %c0_0 = arith.constant 0 : index
    %0 = vector.load %arg1[%c0, %c0_0] : memref<8x128xf32, #tpu.memory_space<vmem>>, vector<8x128xf32>
    %c0_1 = arith.constant 0 : index
    %c0_2 = arith.constant 0 : index
    %1 = vector.load %arg2[%c0_1, %c0_2] : memref<16x8xf32, #tpu.memory_space<vmem>>, vector<16x8xf32>
    %cst = arith.constant dense<0.000000e+00> : vector<16x128xf32>
    %2 = tpu.matmul %1, %0, %cst {dimension_numbers = #tpu.dot_dimension_numbers<[1], [0], [0], [1], [0, 0, 1, 1], [], []>} : vector<16x8xf32>, vector<8x128xf32>, vector<16x128xf32> -> vector<16x128xf32>
    %c0_3 = arith.constant 0 : index
    %c0_4 = arith.constant 0 : index
    %3 = vector.load %arg3[%c0_3, %c0_4] : memref<16x1xf32, #tpu.memory_space<vmem>>, vector<16x1xf32>
    %4 = vector.broadcast %3 : vector<16x1xf32> to vector<16x128xf32>
    %5 = arith.addf %2, %4 : vector<16x128xf32>
    %cst_5 = arith.constant 0.000000e+00 : f32
    %6 = vector.broadcast %cst_5 : f32 to vector<16x128xf32>
    %7 = arith.maximumf %5, %6 : vector<16x128xf32>
    %c0_6 = arith.constant 0 : index
    %c0_7 = arith.constant 0 : index
    %8 = vector.load %arg4[%c0_6, %c0_7] : memref<8x16xf32, #tpu.memory_space<vmem>>, vector<8x16xf32>
    %cst_8 = arith.constant dense<0.000000e+00> : vector<8x128xf32>
    %9 = tpu.matmul %8, %7, %cst_8 {dimension_numbers = #tpu.dot_dimension_numbers<[1], [0], [0], [1], [0, 0, 1, 1], [], []>} : vector<8x16xf32>, vector<16x128xf32>, vector<8x128xf32> -> vector<8x128xf32>
    %c0_9 = arith.constant 0 : index
    %c0_10 = arith.constant 0 : index
    %10 = vector.load %arg5[%c0_9, %c0_10] : memref<8x1xf32, #tpu.memory_space<vmem>>, vector<8x1xf32>
    %11 = vector.broadcast %10 : vector<8x1xf32> to vector<8x128xf32>
    %12 = arith.addf %9, %11 : vector<8x128xf32>
    %cst_11 = arith.constant 0.000000e+00 : f32
    %13 = vector.broadcast %cst_11 : f32 to vector<8x128xf32>
    %14 = arith.maximumf %12, %13 : vector<8x128xf32>
    %15 = vector.extract_strided_slice %14 {offsets = [0, 0], sizes = [3, 128], strides = [1, 1]} : vector<8x128xf32> to vector<3x128xf32>
    %c0_12 = arith.constant 0 : index
    %c0_13 = arith.constant 0 : index
    %16 = vector.load %arg6[%c0_12, %c0_13] : memref<3x128xf32, #tpu.memory_space<vmem>>, vector<3x128xf32>
    tpu.vector_store %arg6[%c0_12, %c0_13], %15 {strides = array<i32>} : memref<3x128xf32, #tpu.memory_space<vmem>>, vector<3x128xf32>,
    return
  }
  func.func @transform_0(%arg0: i32) -> (i32, i32) {
    %c0_i32 = arith.constant 0 : i32
    %c0_i32_0 = arith.constant 0 : i32
    return %c0_i32, %arg0 : i32, i32
  }
  func.func @transform_1(%arg0: i32) -> (i32, i32) {
    %c0_i32 = arith.constant 0 : i32
    %c0_i32_0 = arith.constant 0 : i32
    %c0_i32_1 = arith.constant 0 : i32
    return %c0_i32, %c0_i32_0 : i32, i32
  }
  func.func @transform_2(%arg0: i32) -> (i32, i32) {
    %c0_i32 = arith.constant 0 : i32
    %c0_i32_0 = arith.constant 0 : i32
    %c0_i32_1 = arith.constant 0 : i32
    return %c0_i32, %c0_i32_0 : i32, i32
  }
  func.func @transform_3(%arg0: i32) -> (i32, i32) {
    %c0_i32 = arith.constant 0 : i32
    %c0_i32_0 = arith.constant 0 : i32
    %c0_i32_1 = arith.constant 0 : i32
    return %c0_i32, %c0_i32_0 : i32, i32
  }
  func.func @transform_4(%arg0: i32) -> (i32, i32) {
    %c0_i32 = arith.constant 0 : i32
    %c0_i32_0 = arith.constant 0 : i32
    %c0_i32_1 = arith.constant 0 : i32
    return %c0_i32, %c0_i32_0 : i32, i32
  }
  func.func @transform_5(%arg0: i32) -> (i32, i32) {
    %c0_i32 = arith.constant 0 : i32
    %c0_i32_0 = arith.constant 0 : i32
    return %c0_i32, %arg0 : i32, i32
  }
}

</mosaic_0001>

<bundles_post_ra>
// kernel: feedforward.1
= control target key start
LH: loop header
LB: loop body
LE: loop exit
PB: predicated region body
PF: predicated region fallthrough
CT: control target
= control target key end

     0   :  { %vm35_vm0 = vcmask 64512   ;;  %v232_v3 = vmov 0   ;;  %v233_v6 = vmov 0.0   ;;  %vm234_vm1 = vmmov 0   ;;  %s289_s0 = inlined_call_operand.vmem [shape: f32[8,128], index: 0, kind: input, shape index: {}]   ;;  %s290_s1 = inlined_call_operand.vmem [shape: f32[16,8], index: 1, kind: input, shape index: {}]   ;;  %s291_s2 = inlined_call_operand.vmem [shape: f32[16,1], index: 2, kind: input, shape index: {}]   ;;  %s292_s4 = inlined_call_operand.vmem [shape: f32[8,1], index: 4, kind: input, shape index: {}]   ;;  %s293_s3 = inlined_call_operand.vmem [shape: f32[8,16], index: 3, kind: input, shape index: {}]   ;;  %s294_s5 = inlined_call_operand.vmem [shape: f32[3,128], index: 5, kind: output, shape index: {}]  }
   0x1   :  { %v20_v0 = vld [vmem:[%s289_s0] sm:$0xff]  ;;  %v22_v2 = vld [vmem:[%s290_s1 + $0x8] sm:$0xff]  ;;  %230 = vset.pattern.permute.xlu0 %v232_v3  ;;  %231 = vset.pattern.permute.xlu1 %v232_v3  ;;  %vm126_vm2 = vcmask 130048  }
   0x2   :  { %v21_v1 = vld [vmem:[%s290_s1] sm:$0xff]  ;;  %215 = vmatprep.subr.mxu0 %v20_v0  ;;  %v24_v4 = vld [vmem:[%s291_s2 + $0x8] sm:$0xff]  ;;  %220 = vmatprep.subr.mxu1 %v233_v6 }
   0x3   :  { %217 = vmatprep.mubr.msk.f32.mxu0 %vm35_vm0, %v21_v1  ;;  %216 = vmatpush3.msra.mxu0 %v20_v0  ;;  %v23_v5 = vld [vmem:[%s291_s2] sm:$0xff] }
   0x4   :  { %32 = vperm.xlu0 %230, %v24_v4   ;;  %218 = vmatmul.mubr.msk.f32.vlgmr.msra.gmra.mxu0 %vm35_vm0, %v22_v2  ;;  %v120_v7 = vld [vmem:[%s292_s4] sm:$0xff] }
   0x5   :  { %224 = vmatprep.mubr.msk.f32.mxu1 %vm234_vm1, %v233_v6  ;;  %123 = vperm.xlu1 %231, %v120_v7   ;;  %v119_v16 = vld [vmem:[%s293_s3] sm:$0xff] }
   0x8   :  { %27 = vperm.xlu0 %230, %v23_v5  }
  0x7f   :  { %v33_v8 = vpop.permute.xlu0 %32 }
  0x80   :  { %v124_v17 = vpop.permute.xlu1 %123 }
  0x83   :  { %v28_v11 = vpop.permute.xlu0 %27 }
  0xc4   :  { %v219_v9 = vpop.f32.mrf.mxu0 }
  0xc5   :  { %v114_v10 = vadd.f32 %v219_v9, %v33_v8 }
  0xc6   :  { %v108_v12 = vpop.f32.mrf.mxu0 }
  0xc7   :  { %v118_v13 = vmax.f32 %v114_v10, 0.0  ;;  %v109_v14 = vadd.f32 %v108_v12, %v28_v11 }
  0xc9   :  { %v117_v15 = vmax.f32 %v109_v14, 0.0  ;;  %221 = vmatpush3.msra.mxu1 %v118_v13 }
  0xca   :  { %222 = vmatprep.subr.mxu1 %v233_v6 }
  0xcb   :  { %223 = vmatpush3.msra.mxu1 %v117_v15 }
  0xcc   :  { %225 = vmatmul.mubr.msk.f32.vlgmr.msra.gmra.mxu1 %vm126_vm2, %v119_v16 }
 0x18c   :  { %v196_v18 = vpop.f32.mrf.mxu1 }
 0x18d   :  { %v197_v19 = vadd.f32 %v196_v18, %v124_v17 }
 0x18e   :  { %v226_v20 = vpop.f32.mrf.mxu1 }
 0x18f   :  { %v200_v21 = vmax.f32 %v197_v19, 0.0 }
 0x191   :  { %201 = vst [vmem:[%s294_s5] sm:$0x7] %v200_v21 }

</bundles_post_ra>
